<compile_context>
chip_gen: v5e
topology: v5e:2x2
jax: 0.10.0
libtpu: 0.0.40
codegen_flags: <defaults>
</compile_context>

<pallas_src>
import jax
import jax.numpy as jnp
from jax.experimental import pallas as pl
from jax.experimental.pallas import tpu as pltpu


def _mlp_kernel(x_ref, p_ref, o_ref):
    # x_ref: (1, B_pad)  -- batch along the 128-lane axis
    # p_ref: (H, 4)      -- columns: [w1, b1, w2, b2(broadcast to H rows)]
    # o_ref: (1, B_pad)  -- lane-dense output (batch along lanes)
    x = x_ref[...]                      # (1, Bp)
    w1 = p_ref[:, 0:1]                  # (H, 1)
    b1 = p_ref[:, 1:2]                  # (H, 1)
    w2 = p_ref[:, 2:3]                  # (H, 1)
    b2 = p_ref[0:1, 3:4]                # (1, 1)

    # Hidden layer (K=1 "matmul"): outer product via broadcasting -> pure VPU.
    h = jnp.maximum(w1 * x + b1, 0.0)                   # (H, Bp)
    # Output layer (N=1 "matmul"): per-lane multiply (VPU) + sublane reduce (XLU).
    y = jnp.sum(h * w2, axis=0, keepdims=True) + b2     # (1, Bp)
    o_ref[...] = y.astype(o_ref.dtype)


def net_forward(x, w1, b1, w2, b2):
    """x: (B, 1); w1: (1, H); b1: (H,); w2: (H, 1); b2: (1,). Returns (B, 1)."""
    B, F = x.shape
    H = w1.shape[1]
    O = w2.shape[1]
    assert F == 1 and O == 1, "kernel specialised to the regression Net (F=1, O=1)"

    # Pad batch to a multiple of 128 so every vector op is full-width, and lay
    # it out with batch on the lane axis (lane-dense loads AND stores).
    Bp = ((B + 127) // 128) * 128
    x_row = jnp.zeros((1, Bp), jnp.float32).at[0, :B].set(
        x[:, 0].astype(jnp.float32))

    # Pack all parameters into a single small VMEM operand: 1 DMA instead of 4.
    params = jnp.stack(
        [w1[0, :], b1, w2[:, 0], jnp.broadcast_to(b2, (H,))], axis=1
    ).astype(jnp.float32)               # (H, 4)

    out = pl.pallas_call(
        _mlp_kernel,
        out_shape=jax.ShapeDtypeStruct((1, Bp), jnp.float32),
        in_specs=[
            pl.BlockSpec(memory_space=pltpu.VMEM),   # x_row  (1, Bp)
            pl.BlockSpec(memory_space=pltpu.VMEM),   # params (H, 4)
        ],
        out_specs=pl.BlockSpec(memory_space=pltpu.VMEM),
        # NOTE: if batch is ever scaled up, add a grid over the lane (batch)
        # axis with dimension_semantics=("parallel",) so v7x's two TensorCores
        # split the work, budgeting tiles against its 64 MiB VMEM. At B=100
        # that is pure overhead, so it is intentionally omitted here.
    )(x_row, params)

    # Un-pad / un-transpose outside the kernel (batch back to the row axis).
    return out[0, :B].reshape(B, O).astype(x.dtype)


if __name__ == "__main__":
    # Shapes implied by the script: x = linspace(-1, 1, 100).unsqueeze(1) -> (100, 1)
    n_feature, n_hidden, n_output = 1, 32, 1
    batch = 100

    key = jax.random.PRNGKey(0)
    k1, k2, k3, k4 = jax.random.split(key, 4)

    # PyTorch Linear stores weight as (out, in); build that way, pass transposed
    # so the kernel computes x @ W (== torch's x @ W.T + b).
    w_hidden = jax.random.normal(k1, (n_hidden, n_feature), jnp.float32) * 0.1
    b_hidden = jax.random.normal(k2, (n_hidden,), jnp.float32) * 0.1
    w_predict = jax.random.normal(k3, (n_output, n_hidden), jnp.float32) * 0.1
    b_predict = jax.random.normal(k4, (n_output,), jnp.float32) * 0.1

    # Input: same as the reference script.
    x = jnp.linspace(-1.0, 1.0, batch, dtype=jnp.float32).reshape(batch, n_feature)

    out = net_forward(x, w_hidden.T, b_hidden, w_predict.T, b_predict)
    out = jax.block_until_ready(out)

    # Cross-check against a plain-JAX reference of the same forward pass.
    ref = jnp.maximum(x @ w_hidden.T + b_hidden, 0.0) @ w_predict.T + b_predict
    assert out.shape == (batch, n_output)
    assert jnp.allclose(out, ref, atol=1e-5, rtol=1e-5)

    print("KERNEL_OK")
</pallas_src>

<mosaic_0001>
module attributes {stable_mosaic.version = 11 : i64} {
  func.func @_mlp_kernel(%arg0: memref<1x128xf32, #tpu.memory_space<vmem>>, %arg1: memref<32x4xf32, #tpu.memory_space<vmem>>, %arg2: memref<1x128xf32, #tpu.memory_space<vmem>>) attributes {dimension_semantics = [], scalar_prefetch = 0 : i64, scratch_operands = 0 : i64, tpu.core_type = #tpu.core_type<tc>} {
    %c0 = arith.constant 0 : index
    %c0_0 = arith.constant 0 : index
    %0 = vector.load %arg0[%c0, %c0_0] : memref<1x128xf32, #tpu.memory_space<vmem>>, vector<1x128xf32>
    %c0_1 = arith.constant 0 : index
    %c0_2 = arith.constant 0 : index
    %1 = vector.load %arg1[%c0_1, %c0_2] : memref<32x4xf32, #tpu.memory_space<vmem>>, vector<32x1xf32>
    %c0_3 = arith.constant 0 : index
    %c1 = arith.constant 1 : index
    %2 = vector.load %arg1[%c0_3, %c1] : memref<32x4xf32, #tpu.memory_space<vmem>>, vector<32x1xf32>
    %c0_4 = arith.constant 0 : index
    %c2 = arith.constant 2 : index
    %3 = vector.load %arg1[%c0_4, %c2] : memref<32x4xf32, #tpu.memory_space<vmem>>, vector<32x1xf32>
    %c0_5 = arith.constant 0 : index
    %c3 = arith.constant 3 : index
    %4 = vector.load %arg1[%c0_5, %c3] : memref<32x4xf32, #tpu.memory_space<vmem>>, vector<1x1xf32>
    %5 = vector.broadcast %1 : vector<32x1xf32> to vector<32x128xf32>
    %6 = vector.broadcast %0 : vector<1x128xf32> to vector<32x128xf32>
    %7 = arith.mulf %5, %6 : vector<32x128xf32>
    %8 = vector.broadcast %2 : vector<32x1xf32> to vector<32x128xf32>
    %9 = arith.addf %7, %8 : vector<32x128xf32>
    %cst = arith.constant 0.000000e+00 : f32
    %10 = vector.broadcast %cst : f32 to vector<32x128xf32>
    %11 = arith.maximumf %9, %10 : vector<32x128xf32>
    %12 = vector.broadcast %3 : vector<32x1xf32> to vector<32x128xf32>
    %13 = arith.mulf %11, %12 : vector<32x128xf32>
    %cst_6 = arith.constant dense<0.000000e+00> : vector<128xf32>
    %14 = vector.multi_reduction <add>, %13, %cst_6 [0] : vector<32x128xf32> to vector<128xf32>
    %15 = vector.shape_cast %14 : vector<128xf32> to vector<1x128xf32>
    %16 = vector.broadcast %4 : vector<1x1xf32> to vector<1x128xf32>
    %17 = arith.addf %15, %16 : vector<1x128xf32>
    %c0_7 = arith.constant 0 : index
    %c0_8 = arith.constant 0 : index
    %18 = vector.load %arg2[%c0_7, %c0_8] : memref<1x128xf32, #tpu.memory_space<vmem>>, vector<1x128xf32>
    tpu.vector_store %arg2[%c0_7, %c0_8], %17 {strides = array<i32>} : memref<1x128xf32, #tpu.memory_space<vmem>>, vector<1x128xf32>,
    return
  }
}

</mosaic_0001>

<bundles_post_ra>
// kernel: tpu_custom_call.1
= control target key start
LH: loop header
LB: loop body
LE: loop exit
PB: predicated region body
PF: predicated region fallthrough
CT: control target
= control target key end

     0   :  { %v164_v2 = vmov 0   ;;  %s205_s0 = inlined_call_operand.vmem [shape: f32[1,128], index: 0, kind: input, shape index: {}]   ;;  %s206_s1 = inlined_call_operand.vmem [shape: f32[32,4], index: 1, kind: input, shape index: {}]   ;;  %s207_s2 = inlined_call_operand.hbm [shape: f32[1,128], index: 2, kind: output, shape index: {}]  }
   0x1   :  { %v15_v0 = vld [vmem:[%s206_s1 + $0x10] sm:$0xff]  ;;  %v13_v1 = vld [vmem:[%s206_s1] sm:$0xff]  ;;  %127 = vset.pattern.permute.xlu1 %v164_v2  ;;  %126 = vset.pattern.permute.xlu0 %v164_v2 }
   0x2   :  { %7 = vsyncpa [#allocation3], 0  ;;  %30 = vperm.xlu1 %127, %v15_v0   ;;  %20 = vperm.xlu0 %126, %v13_v1   ;;  %v14_v3 = vld [vmem:[%s206_s1 + $0x8] sm:$0xff]  ;;  %v165_v4 = vmov 1   ;;  %v16_v5 = vld [vmem:[%s206_s1 + $0x18] sm:$0xff]  ;;  %v166_v6 = vmov 2  }
   0x3   :  { %129 = vset.pattern.permute.xlu2 %v165_v4  ;;  %v17_v7 = vld [vmem:[%s206_s1] sm:$0x1]  ;;  %v167_v8 = vmov 3   ;;  %s112_s23 = sshll.u32 %s207_s2, 4  ;;  %s113_s23 = int_to_ptr.hbm [resolvable:$true] %s112_s23 }
   0x4   :  { %50 = vperm.xlu2 %129, %v14_v3   ;;  %v137_v15 = vld [vmem:[%s205_s0] ss:$0 sm:$0xff]  ;;  %s168_s0 = smov [#allocation2]  }
   0x5   :  { %s110_s1 = sshll.u32 %s168_s0, 4  ;;  %s111_s1 = int_to_ptr.vmem [resolvable:$true] %s110_s1 }
   0xa   :  { %128 = vset.pattern.permute.xlu1 %v165_v4  ;;  %25 = vperm.xlu0 %126, %v14_v3  }
   0xb   :  { %46 = vperm.xlu1 %128, %v13_v1  }
   0xc   :  { %130 = vset.pattern.permute.xlu2 %v164_v2 }
   0xd   :  { %35 = vperm.xlu2 %130, %v16_v5  }
  0x12   :  { %131 = vset.pattern.permute.xlu0 %v165_v4 }
  0x13   :  { %58 = vperm.xlu1 %128, %v16_v5   ;;  %54 = vperm.xlu0 %131, %v15_v0  }
  0x15   :  { %132 = vset.pattern.permute.xlu2 %v166_v6 }
  0x16   :  { %70 = vperm.xlu2 %132, %v13_v1  }
  0x1b   :  { %133 = vset.pattern.permute.xlu1 %v166_v6  ;;  %134 = vset.pattern.permute.xlu0 %v166_v6 }
  0x1c   :  { %74 = vperm.xlu1 %133, %v14_v3   ;;  %82 = vperm.xlu0 %134, %v16_v5  }
  0x1e   :  { %78 = vperm.xlu2 %132, %v15_v0  }
  0x24   :  { %135 = vset.pattern.permute.xlu1 %v167_v8  ;;  %136 = vset.pattern.permute.xlu0 %v167_v8 }
  0x25   :  { %100 = vperm.xlu1 %135, %v17_v7  }
  0x5e   :  { %v51_v9 = vpop.permute.xlu2 %50 }
  0x67   :  { %v36_v12 = vpop.permute.xlu2 %35 }
  0x68   :  { %v44_v25 = vmul.f32 %v137_v15, %v36_v12 }
  0x70   :  { %v71_v16 = vpop.permute.xlu2 %70 }
  0x74   :  { %v31_v10 = vpop.permute.xlu1 %30  ;;  %v21_v11 = vpop.permute.xlu0 %20 }
  0x75   :  { %v41_v17 = vmul.f32 %v137_v15, %v21_v11  ;;  %v43_v21 = vmul.f32 %v137_v15, %v31_v10 }
  0x78   :  { %v79_v30 = vpop.permute.xlu2 %78 }
  0x7c   :  { %v26_v13 = vpop.permute.xlu0 %25 }
  0x7d   :  { %v47_v14 = vpop.permute.xlu1 %46  ;;  %v42_v18 = vmul.f32 %v137_v15, %v26_v13 }
  0x7e   :  { %v61_v22 = vadd.f32 %v47_v14, %v41_v17 }
  0x7f   :  { %v62_v23 = vadd.f32 %v51_v9, %v42_v18 }
  0x80   :  { %v65_v26 = vmax.f32 %v61_v22, 0.0 }
  0x81   :  { %v66_v29 = vmax.f32 %v62_v23, 0.0 }
  0x82   :  { %v85_v32 = vmul.f32 %v71_v16, %v65_v26 }
  0x85   :  { %v59_v19 = vpop.permute.xlu1 %58  ;;  %v55_v20 = vpop.permute.xlu0 %54 }
  0x86   :  { %v63_v24 = vadd.f32 %v55_v20, %v43_v21  ;;  %v64_v27 = vadd.f32 %v59_v19, %v44_v25 }
  0x88   :  { %v67_v28 = vmax.f32 %v63_v24, 0.0  ;;  %v68_v35 = vmax.f32 %v64_v27, 0.0 }
  0x8a   :  { %v87_v36 = vmul.f32 %v79_v30, %v67_v28 }
  0x8e   :  { %v75_v31 = vpop.permute.xlu1 %74  ;;  %v83_v34 = vpop.permute.xlu0 %82 }
  0x8f   :  { %v86_v33 = vmul.f32 %v75_v31, %v66_v29  ;;  %v88_v38 = vmul.f32 %v83_v34, %v68_v35 }
  0x91   :  { %v89_v37 = vadd.f32 %v86_v33, %v85_v32 }
  0x93   :  { %v90_v39 = vadd.f32 %v89_v37, %v87_v36 }
  0x95   :  { %v91_v40 = vadd.f32 %v90_v39, %v88_v38 }
  0x97   :  { %v92_v41 = vrot.slane %v91_v40, 4  ;;  %v101_v46 = vpop.permute.xlu1 %100 }
  0x99   :  { %v93_v42 = vadd.f32 %v92_v41, %v91_v40 }
  0x9b   :  { %v94_v43 = vrot.slane %v93_v42, 2 }
  0x9d   :  { %v95_v44 = vadd.f32 %v94_v43, %v93_v42 }
  0x9f   :  { %v96_v45 = vrot.slane %v95_v44, 1 }
  0xa1   :  { %v97_v47 = vadd.f32 %v96_v45, %v95_v44 }
  0xa3   :  { %v103_v48 = vadd.f32 %v101_v46, %v97_v47 }
  0xa5   :  { %104 = vst [vmem:[#allocation2] sm:$0x1] %v103_v48 }
  0xa6   :  { %115 = dma.vmem_to_hbm [thread:$0]  %s111_s1, 16, %s113_s23, [#allocation3]  }
  0xa7   :  { %162 = dma.done.wait [#allocation3], 16  }
  0xa8   :  { %163 = vsyncadd [#allocation3], 4294967280 }
  0xa9   :  { %120 = vsyncpa [#allocation3], 1 }

</bundles_post_ra>
